<compile_context>
chip_gen: v5e
topology: v5e:2x2
jax: 0.10.0
libtpu: 0.0.40
codegen_flags: <defaults>
</compile_context>

<pallas_src>
import math

import jax
import jax.numpy as jnp
from jax.experimental import pallas as pl
from jax.experimental.pallas import tpu as pltpu


# ~4 MiB tiles: measured f32-add sweeps show >=85% of HBM roofline at this
# size; 2 inputs x 2 outputs double buffers ~= 16 MiB of VMEM.
_TARGET_TILE_BYTES = 4 * 1024 * 1024
# Honored above v5e's 16 MiB scoped default, below v7x's 64 MiB physical VMEM.
_VMEM_LIMIT_BYTES = 48 * 1024 * 1024


def _residual_block_kernel(x_ref, o_ref):
    # blocks = Identity, shortcut = Identity  =>  out = x + x.
    v = x_ref[...]            # load once, reuse for both "blocks" and residual
    o_ref[...] = v + v


def _compiler_params(num_grid_axes):
    return pltpu.CompilerParams(
        dimension_semantics=("parallel",) * num_grid_axes,
        vmem_limit_bytes=_VMEM_LIMIT_BYTES,
    )


def _cost(total, itemsize):
    return pl.CostEstimate(flops=total, transcendentals=0,
                           bytes_accessed=2 * total * itemsize)


def _forward_2d(x, total, cols, inplace):
    """Lane-aligned fast path: zero-copy reshape to (rows, cols) and row-tile."""
    rows = total // cols
    itemsize = jnp.dtype(x.dtype).itemsize

    block_rows = max(8, (_TARGET_TILE_BYTES // (cols * itemsize)) // 8 * 8)
    if block_rows >= rows:
        if rows >= 16:
            # Whole tensor fits one tile: still split into two row blocks so
            # both v7x TCs get work and input DMA overlaps compute/output DMA.
            block_rows = ((rows + 15) // 16) * 8   # ceil(rows/2) -> multiple of 8
        else:
            block_rows = rows                      # tiny: one full-extent block
    grid_rows = pl.cdiv(rows, block_rows)          # ragged last block is masked

    x2d = x.reshape(rows, cols)                    # zero-copy (contiguous input)
    out2d = pl.pallas_call(
        _residual_block_kernel,
        out_shape=jax.ShapeDtypeStruct((rows, cols), x.dtype),
        grid=(grid_rows,),
        in_specs=[pl.BlockSpec((block_rows, cols), lambda i: (i, 0))],
        out_specs=pl.BlockSpec((block_rows, cols), lambda i: (i, 0)),
        input_output_aliases=({0: 0} if inplace else {}),
        compiler_params=_compiler_params(1),
        cost_estimate=_cost(total, itemsize),
    )(x2d)
    return out2d.reshape(x.shape)


def _forward_nd(x, total, inplace):
    """Rare path: element count not divisible by 128, so no lane-aligned 2-D
    reshape exists.  Run on the collapsed native layout with the last two dims
    at full extent (always a legal block) — no pad / slice / concat, so HBM is
    read and written exactly once."""
    itemsize = jnp.dtype(x.dtype).itemsize
    if x.ndim == 0:
        x3 = x.reshape(1, 1, 1)
    elif x.ndim == 1:
        x3 = x.reshape(1, 1, x.shape[0])
    else:
        lead = math.prod(x.shape[:-2])
        x3 = x.reshape(lead, x.shape[-2], x.shape[-1])     # zero-copy collapse
    L, R, C = x3.shape

    row_bytes = max(1, C * itemsize)
    block_r = max(8, (_TARGET_TILE_BYTES // row_bytes) // 8 * 8)
    if block_r >= R:
        block_r = R                  # full extent (legal even if R % 8 != 0)
    # TODO(synk): pathologically unaligned shapes with a single enormous last
    # dim are not additionally tiled along C; real ResNet activations never
    # reach this fallback with such shapes.

    out3 = pl.pallas_call(
        _residual_block_kernel,
        out_shape=jax.ShapeDtypeStruct((L, R, C), x.dtype),
        grid=(L, pl.cdiv(R, block_r)),
        in_specs=[pl.BlockSpec((1, block_r, C), lambda i, j: (i, j, 0))],
        out_specs=pl.BlockSpec((1, block_r, C), lambda i, j: (i, j, 0)),
        input_output_aliases=({0: 0} if inplace else {}),
        compiler_params=_compiler_params(2),
        cost_estimate=_cost(total, itemsize),
    )(x3)
    return out3.reshape(x.shape)


def residual_block_forward(x, in_channels, out_channels, *, inplace=False):
    """Pallas ResidualBlock.forward (numerically out = 2*x).

    in_channels / out_channels only gate whether the (Identity) shortcut is
    applied in the reference module — numerically irrelevant, kept for API
    fidelity.  inplace=True aliases the output onto the input HBM buffer
    (PyTorch's `x += residual`); leave False unless the input is donated,
    otherwise XLA inserts a defensive copy (an extra HBM pass).
    """
    del in_channels, out_channels
    total = math.prod(x.shape) if x.shape else 1
    for cols in (4096, 2048, 1024, 512, 256, 128):   # widest lane-dense slab first
        if total >= cols and total % cols == 0:
            return _forward_2d(x, total, cols, inplace)
    return _forward_nd(x, total, inplace)


class ResidualBlockPallas:
    """Mirror of the PyTorch ResidualBlock (no parameters: both sub-modules
    are nn.Identity, so there is nothing to initialize)."""

    def __init__(self, in_channels, out_channels):
        self.in_channels = in_channels
        self.out_channels = out_channels

    @property
    def should_apply_shortcut(self):
        return self.in_channels != self.out_channels

    def __call__(self, x, *, inplace=False):
        return residual_block_forward(x, self.in_channels, self.out_channels,
                                      inplace=inplace)


if __name__ == "__main__":
    key = jax.random.PRNGKey(0)

    # Small NCHW conv-style input (lane-aligned fast path).
    N, C, H, W = 2, 4, 16, 16
    x = jax.random.normal(key, (N, C, H, W), dtype=jnp.float32)
    block = ResidualBlockPallas(in_channels=C, out_channels=C)
    out = jax.block_until_ready(block(x))
    ref = x + x
    assert out.shape == x.shape and out.dtype == x.dtype
    assert jnp.allclose(out, ref, atol=0.0, rtol=0.0)

    # Non-128-multiple element count: exercises the no-pad native-layout path.
    x2 = jax.random.normal(key, (3, 5, 7, 9), dtype=jnp.float32)
    out2 = jax.block_until_ready(
        ResidualBlockPallas(in_channels=5, out_channels=8)(x2))
    assert jnp.allclose(out2, x2 + x2, atol=0.0, rtol=0.0)

    # Larger tensor: multiple row tiles, >=2 grid steps for megacore/pipelining.
    x3 = jax.random.normal(key, (4, 8, 64, 64), dtype=jnp.float32)
    out3 = jax.block_until_ready(ResidualBlockPallas(8, 8)(x3))
    assert jnp.allclose(out3, x3 + x3, atol=0.0, rtol=0.0)

    # Exercise the inplace (input_output_aliases) code path once.
    x4 = jax.random.normal(key, (2, 4, 16, 16), dtype=jnp.float32)
    ref4 = x4 + x4
    out4 = jax.block_until_ready(ResidualBlockPallas(4, 4)(x4, inplace=True))
    assert jnp.allclose(out4, ref4, atol=0.0, rtol=0.0)

    print("KERNEL_OK")
</pallas_src>

<mosaic_0001>
module attributes {stable_mosaic.version = 11 : i64} {
  func.func @_residual_block_kernel(%arg0: i32, %arg1: memref<1x2048xf32, #tpu.memory_space<vmem>>, %arg2: memref<1x2048xf32, #tpu.memory_space<vmem>>) attributes {dimension_semantics = [#tpu.dimension_semantics<parallel>], iteration_bounds = array<i64: 1>, scalar_prefetch = 0 : i64, scratch_operands = 0 : i64, tpu.core_type = #tpu.core_type<tc>, window_params = [{transform_indices = @transform_0, window_bounds = array<i64: 1, 2048>}, {transform_indices = @transform_1, window_bounds = array<i64: 1, 2048>}]} {
    %c0 = arith.constant 0 : index
    %c0_0 = arith.constant 0 : index
    %0 = vector.load %arg1[%c0, %c0_0] : memref<1x2048xf32, #tpu.memory_space<vmem>>, vector<1x2048xf32>
    %1 = arith.addf %0, %0 : vector<1x2048xf32>
    %c0_1 = arith.constant 0 : index
    %c0_2 = arith.constant 0 : index
    %2 = vector.load %arg2[%c0_1, %c0_2] : memref<1x2048xf32, #tpu.memory_space<vmem>>, vector<1x2048xf32>
    tpu.vector_store %arg2[%c0_1, %c0_2], %1 {strides = array<i32>} : memref<1x2048xf32, #tpu.memory_space<vmem>>, vector<1x2048xf32>,
    return
  }
  func.func @transform_0(%arg0: i32) -> (i32, i32) {
    %c0_i32 = arith.constant 0 : i32
    %c0_i32_0 = arith.constant 0 : i32
    return %arg0, %c0_i32 : i32, i32
  }
  func.func @transform_1(%arg0: i32) -> (i32, i32) {
    %c0_i32 = arith.constant 0 : i32
    %c0_i32_0 = arith.constant 0 : i32
    return %arg0, %c0_i32 : i32, i32
  }
}

</mosaic_0001>

<bundles_post_ra>
// kernel: tpu_custom_call.1
= control target key start
LH: loop header
LB: loop body
LE: loop exit
PB: predicated region body
PF: predicated region fallthrough
CT: control target
= control target key end

     0   :  { %6 = vsyncpa [#allocation3], 0  ;;  %s118_s0 = inlined_call_operand.hbm [shape: f32[1,2048], index: 0, kind: input, shape index: {}]   ;;  %s119_s1 = inlined_call_operand.hbm [shape: f32[1,2048], index: 1, kind: output, shape index: {}]  }
   0x1   :  { %7 = vsyncpa [#allocation4], 0  ;;  %s13_s8 = sshll.u32 %s118_s0, 4  ;;  %s100_s9 = smov [#allocation2]   ;;  %s14_s8 = int_to_ptr.hbm [resolvable:$true] %s13_s8 }
   0x2   :  { %s15_s10 = sshll.u32 %s100_s9, 4  ;;  %s16_s10 = int_to_ptr.vmem [resolvable:$true] %s15_s10 }
   0x3   :  { %18 = dma.hbm_to_vmem [thread:$0]  %s14_s8, 256, %s16_s10, [#allocation3]  }
   0x4   :  { %96 = dma.done.wait [#allocation3], 256  }
   0x5   :  { %97 = vsyncadd [#allocation3], 4294967040  ;;  %s101_s11 = smov [#allocation5]   ;;  %s36_s15 = sshll.u32 %s119_s1, 4  ;;  %v23_v0 = vld [vmem:[#allocation2] sm:$0xff]  ;;  %v24_v1 = vld [vmem:[#allocation2 + $0x8] sm:$0xff]  ;;  %s37_s15 = int_to_ptr.hbm [resolvable:$true] %s36_s15 }
   0x6   :  { %s34_s12 = sshll.u32 %s101_s11, 4  ;;  %v25_v2 = vadd.f32 %v23_v0, %v23_v0  ;;  %v26_v3 = vadd.f32 %v24_v1, %v24_v1  ;;  %s35_s12 = int_to_ptr.vmem [resolvable:$true] %s34_s12 }
   0x8   :  { %27 = vst [vmem:[#allocation5] sm:$0xff] %v25_v2 }
   0x9   :  { %28 = vst [vmem:[#allocation5 + $0x8] sm:$0xff] %v26_v3 }
   0xa   :  { %39 = dma.vmem_to_hbm [thread:$0]  %s35_s12, 256, %s37_s15, [#allocation4]  }
   0xb   :  { %98 = dma.done.wait [#allocation4], 256  }
   0xc   :  { %99 = vsyncadd [#allocation4], 4294967040 }
   0xd   :  { %44 = vsyncpa [#allocation3], 1 }
   0xe   :  { %45 = vsyncpa [#allocation4], 1 }

</bundles_post_ra>
